<compile_context>
chip_gen: v7x
topology: tpu7x:2x2x1
jax: 0.10.0
libtpu: 0.0.40
codegen_flags: <defaults>
</compile_context>

<pallas_src>
import jax
import jax.numpy as jnp
from jax.experimental import pallas as pl
from jax.experimental.pallas import tpu as pltpu

_LANE = 128
_MAX_BLOCK_ROWS = 8192     # cap per-step sublane->lane relayout of the (rows,1) result
_MIN_GRID_STEPS = 4        # >= 2 grid steps per TensorCore on v7x megacore
_PER_TILE_CAP = 16 << 20   # never exceed 16 MiB per (double-buffered) input tile


def _round_up(x, m):
    return -(-x // m) * m


def _vmem_capacity_bytes():
    """Best-effort physical VMEM capacity; conservative 64 MiB fallback."""
    try:
        cap = int(pltpu.get_tpu_info().vmem_capacity_bytes)
        if cap > 0:
            return cap
    except Exception:
        pass
    try:
        kind = jax.devices()[0].device_kind.lower()
        if ("v5" in kind) or ("v6" in kind):
            return 128 << 20
    except Exception:
        pass
    return 64 << 20  # v7x-sized conservative default


def _has_bf16_vpu():
    """v6e/v7x VPUs are bf16-capable; v5e is not."""
    try:
        kind = jax.devices()[0].device_kind.lower()
    except Exception:
        return False
    return ("v6" in kind) or ("v7" in kind)


def _choose_tiling(nc, hw, itemsize, compute_itemsize):
    """Pick (block_rows, block_hw, num_row_blocks, num_hw_blocks, vmem_limit)."""
    vmem_cap = _vmem_capacity_bytes()

    # Per-element VMEM footprint of one pipelined step:
    #   2x double-buffered input + ~2 compute-width temporaries + f32 reduce temp.
    bytes_per_elem = 2 * itemsize + 2 * compute_itemsize + 4
    budget_elems = max((vmem_cap - (16 << 20)) // bytes_per_elem, 1 << 18)
    tile_elems = min(budget_elems, _PER_TILE_CAP // itemsize)

    # Minimum sublane multiple for packed dtypes: f32 -> 8, bf16 -> 16, int8 -> 32.
    row_mult = max(8, 32 // itemsize)
    hw_pad_lane = _round_up(hw, _LANE)   # true lane-padded VMEM width of a row

    rows_fit = tile_elems // hw_pad_lane
    if rows_fit >= row_mult:
        # Whole (lane-padded) feature map fits in one buffer: no HW split.
        block_hw = hw
        num_hw_blocks = 1
        rows_cap = min(int(rows_fit), _MAX_BLOCK_ROWS)
        rows_cap = max(row_mult, (rows_cap // row_mult) * row_mult)
        rows_for_steps = _round_up(max(1, -(-nc // _MIN_GRID_STEPS)), row_mult)
        block_rows = max(row_mult, min(rows_cap, rows_for_steps))
    else:
        # Feature map too large for one buffer: split H*W across an "arbitrary"
        # grid axis and accumulate partial sums in VMEM scratch.
        block_rows = row_mult
        block_hw = max(_LANE, ((tile_elems // row_mult) // _LANE) * _LANE)
        num_hw_blocks = -(-hw // block_hw)

    num_row_blocks = -(-nc // block_rows)

    # vmem_limit from the real (8,128)-tiled footprint of one step.
    padded_hw_blk = hw_pad_lane if num_hw_blocks == 1 else block_hw
    step_elems = block_rows * padded_hw_blk
    acc_bytes = block_rows * _LANE * 4                              # (rows,1) f32 scratch, lane-padded
    out_bytes = 2 * 8 * _round_up(block_rows, _LANE) * itemsize     # (1,rows) out tile, double-buffered
    vmem_limit = step_elems * bytes_per_elem + acc_bytes + out_bytes + (4 << 20)
    vmem_limit = max(vmem_limit, 32 << 20)
    vmem_limit = min(vmem_limit, vmem_cap - (2 << 20))

    return block_rows, block_hw, num_row_blocks, num_hw_blocks, int(vmem_limit)


def _make_gem_kernel(eps, hw, block_rows, n_hw_pad, native_compute):
    eps = float(eps)
    inv_hw = 1.0 / float(hw)
    n_hw_pad = int(n_hw_pad)   # zero-padded lanes at the end of the HW axis (clamp to eps)

    def kernel(p_ref, x_ref, o_ref, acc_ref):
        # p_ref   : (1, 1) f32 in SMEM            -- the learnable exponent p
        # x_ref   : (block_rows, block_hw) tile in VMEM
        # o_ref   : (1, block_rows) lane-dense output tile in VMEM
        # acc_ref : (block_rows, 1) f32 partial-sum scratch (persists across HW steps)
        j = pl.program_id(1)
        p = p_ref[0, 0]

        @pl.when(j == 0)
        def _():
            acc_ref[...] = jnp.zeros_like(acc_ref)

        x = x_ref[...]
        if not native_compute:
            x = x.astype(jnp.float32)      # widen (e.g. bf16 on v5e: no bf16 VPU)
        xc = jnp.maximum(x, eps)           # clamp(min=eps); keeps log() safe

        def accumulate(xp):
            # Row sum accumulated in f32 regardless of compute dtype.
            acc_ref[...] += jnp.sum(xp, axis=-1, keepdims=True, dtype=jnp.float32)

        # VPU-only fast paths for common integer p (default p = 3); keeps the
        # kernel HBM-bound instead of EUP-bound on v6e/v7x.
        is_p1 = p == 1.0
        is_p2 = p == 2.0
        is_p3 = p == 3.0
        is_p4 = p == 4.0
        is_int_fast = is_p1 | is_p2 | is_p3 | is_p4

        @pl.when(is_p3)
        def _():
            accumulate(xc * xc * xc)

        @pl.when(is_p2)
        def _():
            accumulate(xc * xc)

        @pl.when(is_p1)
        def _():
            accumulate(xc)

        @pl.when(is_p4)
        def _():
            x2 = xc * xc
            accumulate(x2 * x2)

        @pl.when(jnp.logical_not(is_int_fast))
        def _():
            # General p: 2 EUP transcendentals/element -- EUP-bound on v7x.
            xc32 = xc.astype(jnp.float32)
            accumulate(jnp.exp(p * jnp.log(xc32)))

        @pl.when(j == pl.num_programs(1) - 1)
        def _():
            s = acc_ref[...]                                  # (block_rows, 1) f32
            if n_hw_pad:
                # HW-padded lanes were zeros -> clamped to exactly eps; remove
                # their (tiny) contribution exactly.
                s = s - jnp.float32(n_hw_pad) * jnp.exp(p * jnp.log(jnp.float32(eps)))
            m = s * inv_hw                                    # mean over H*W, m >= eps**p > 0
            out = jnp.exp(jnp.log(m) * (1.0 / p))
            # Sublane->lane relayout (bounded by _MAX_BLOCK_ROWS) for a
            # lane-dense, unmasked output store.
            o_ref[...] = out.reshape(1, block_rows).astype(o_ref.dtype)

    return kernel


def gem_pool(x, p, eps=1e-6):
    """x: (N, C, H, W); p: scalar parameter (shape (1,) like nn.Parameter).

    Returns the GeM-pooled tensor of shape (N, C, 1, 1)."""
    N, C, H, W = x.shape
    NC, HW = N * C, H * W
    dtype = jnp.dtype(x.dtype)
    itemsize = dtype.itemsize

    # Compute in the input dtype when the VPU supports it (f32 always; bf16 on
    # v6e/v7x); otherwise widen to f32 (e.g. bf16 on v5e, int8 anywhere).
    native_compute = (dtype == jnp.dtype(jnp.float32)) or (
        dtype == jnp.dtype(jnp.bfloat16) and _has_bf16_vpu()
    )
    compute_itemsize = itemsize if native_compute else 4

    block_rows, block_hw, num_row_blocks, num_hw_blocks, vmem_limit = _choose_tiling(
        NC, HW, itemsize, compute_itemsize
    )

    nc_pad = num_row_blocks * block_rows
    hw_pad = num_hw_blocks * block_hw     # == HW when there is no HW split

    x2d = x.reshape(NC, HW)
    if nc_pad != NC or hw_pad != HW:
        # Zero padding: clamps to eps in-kernel (row pads discarded, HW pads
        # corrected exactly in the kernel's finalize step).
        x2d = jnp.pad(x2d, ((0, nc_pad - NC), (0, hw_pad - HW)))

    p_arr = jnp.asarray(p, dtype=jnp.float32).reshape(1, 1)

    out2d = pl.pallas_call(
        _make_gem_kernel(eps, HW, block_rows, hw_pad - HW, native_compute),
        out_shape=jax.ShapeDtypeStruct((num_row_blocks, block_rows), x.dtype),
        grid=(num_row_blocks, num_hw_blocks),
        in_specs=[
            pl.BlockSpec(memory_space=pltpu.MemorySpace.SMEM),            # p (scalar)
            pl.BlockSpec((block_rows, block_hw), lambda i, j: (i, j)),    # x tile
        ],
        out_specs=pl.BlockSpec((1, block_rows), lambda i, j: (i, 0)),     # lane-dense row
        scratch_shapes=[pltpu.VMEM((block_rows, 1), jnp.float32)],        # partial sums
        compiler_params=pltpu.CompilerParams(
            dimension_semantics=("parallel", "arbitrary"),
            vmem_limit_bytes=int(vmem_limit),
        ),
    )(p_arr, x2d)

    return out2d.reshape(-1)[:NC].reshape(N, C, 1, 1)


def gem_pool_ref(x, p, eps=1e-6):
    """Pure-JAX reference mirroring the PyTorch forward."""
    xc = jnp.maximum(x.astype(jnp.float32), eps)
    xp = jnp.power(xc, p)
    m = jnp.mean(xp, axis=(-2, -1), keepdims=True)
    return jnp.power(m, 1.0 / p).astype(x.dtype)


if __name__ == "__main__":
    key = jax.random.PRNGKey(0)
    x = jax.random.uniform(key, (2, 4, 16, 16), dtype=jnp.float32)

    # Default module init: p = 3.0 (VPU cube fast path).
    p3 = jnp.ones((1,), dtype=jnp.float32) * 3.0
    out3 = jax.block_until_ready(gem_pool(x, p3))
    ref3 = gem_pool_ref(x, p3[0])
    assert out3.shape == (2, 4, 1, 1), out3.shape
    assert jnp.allclose(out3, ref3, rtol=1e-4, atol=1e-5), (
        float(jnp.max(jnp.abs(out3 - ref3)))
    )

    # Another integer p fast path (p = 2).
    p2 = jnp.ones((1,), dtype=jnp.float32) * 2.0
    out2 = jax.block_until_ready(gem_pool(x, p2))
    ref2 = gem_pool_ref(x, p2[0])
    assert jnp.allclose(out2, ref2, rtol=1e-4, atol=1e-5), (
        float(jnp.max(jnp.abs(out2 - ref2)))
    )

    # Non-integer p (general exp(p * log x) EUP path).
    p25 = jnp.ones((1,), dtype=jnp.float32) * 2.5
    out25 = jax.block_until_ready(gem_pool(x, p25))
    ref25 = gem_pool_ref(x, p25[0])
    assert jnp.allclose(out25, ref25, rtol=1e-4, atol=1e-5), (
        float(jnp.max(jnp.abs(out25 - ref25)))
    )

    # bf16 input (native bf16 compute on v6e/v7x, widened on v5e).
    xb = x.astype(jnp.bfloat16)
    outb = jax.block_until_ready(gem_pool(xb, p3))
    refb = gem_pool_ref(xb, p3[0])
    assert jnp.allclose(outb.astype(jnp.float32), refb.astype(jnp.float32),
                        rtol=2e-2, atol=1e-3), (
        float(jnp.max(jnp.abs(outb.astype(jnp.float32) - refb.astype(jnp.float32))))
    )

    print("KERNEL_OK")
</pallas_src>

<mosaic_0001>
module attributes {stable_mosaic.version = 11 : i64} {
  func.func @kernel(%arg0: i32, %arg1: i32, %arg2: memref<1x1xf32, #tpu.memory_space<smem>>, %arg3: memref<8x256xf32, #tpu.memory_space<vmem>>, %arg4: memref<1x8xf32, #tpu.memory_space<vmem>>, %arg5: memref<8x1xf32, #tpu.memory_space<vmem>>) attributes {dimension_semantics = [#tpu.dimension_semantics<parallel>, #tpu.dimension_semantics<arbitrary>], iteration_bounds = array<i64: 1, 1>, scalar_prefetch = 0 : i64, scratch_operands = 1 : i64, tpu.core_type = #tpu.core_type<tc>, window_params = [{transform_indices = @transform_0, window_bounds = array<i64: 1, 1>}, {transform_indices = @transform_1, window_bounds = array<i64: 8, 256>}, {transform_indices = @transform_2, window_bounds = array<i64: 1, 8>}]} {
    %c0 = arith.constant 0 : index
    %c0_0 = arith.constant 0 : index
    %0 = memref.load %arg2[%c0, %c0_0] : memref<1x1xf32, #tpu.memory_space<smem>>
    %c0_i32 = arith.constant 0 : i32
    %1 = arith.cmpi eq, %arg1, %c0_i32 : i32
    %2 = arith.extui %1 : i1 to i32
    %c0_i32_1 = arith.constant 0 : i32
    %3 = arith.cmpi ne, %2, %c0_i32_1 : i32
    scf.if %3 {
      %cst_15 = arith.constant 0.000000e+00 : f32
      %28 = vector.broadcast %cst_15 : f32 to vector<8x1xf32>
      %c0_16 = arith.constant 0 : index
      %c0_17 = arith.constant 0 : index
      %29 = vector.load %arg5[%c0_16, %c0_17] : memref<8x1xf32, #tpu.memory_space<vmem>>, vector<8x1xf32>
      tpu.vector_store %arg5[%c0_16, %c0_17], %28 {strides = array<i32>} : memref<8x1xf32, #tpu.memory_space<vmem>>, vector<8x1xf32>,
    } else {
    }
    %c0_2 = arith.constant 0 : index
    %c0_3 = arith.constant 0 : index
    %4 = vector.load %arg3[%c0_2, %c0_3] : memref<8x256xf32, #tpu.memory_space<vmem>>, vector<8x256xf32>
    %cst = arith.constant 9.99999997E-7 : f32
    %5 = vector.broadcast %cst : f32 to vector<8x256xf32>
    %6 = arith.maximumf %4, %5 : vector<8x256xf32>
    %cst_4 = arith.constant 1.000000e+00 : f32
    %7 = arith.cmpf oeq, %0, %cst_4 : f32
    %cst_5 = arith.constant 2.000000e+00 : f32
    %8 = arith.cmpf oeq, %0, %cst_5 : f32
    %cst_6 = arith.constant 3.000000e+00 : f32
    %9 = arith.cmpf oeq, %0, %cst_6 : f32
    %cst_7 = arith.constant 4.000000e+00 : f32
    %10 = arith.cmpf oeq, %0, %cst_7 : f32
    %11 = arith.ori %7, %8 : i1
    %12 = arith.ori %11, %9 : i1
    %13 = arith.ori %12, %10 : i1
    %14 = arith.extui %9 : i1 to i32
    %c0_i32_8 = arith.constant 0 : i32
    %15 = arith.cmpi ne, %14, %c0_i32_8 : i32
    scf.if %15 {
      %28 = arith.mulf %6, %6 : vector<8x256xf32>
      %29 = arith.mulf %28, %6 : vector<8x256xf32>
      %c0_15 = arith.constant 0 : index
      %c0_16 = arith.constant 0 : index
      %30 = vector.load %arg5[%c0_15, %c0_16] : memref<8x1xf32, #tpu.memory_space<vmem>>, vector<8x1xf32>
      %cst_17 = arith.constant dense<0.000000e+00> : vector<8xf32>
      %31 = vector.multi_reduction <add>, %29, %cst_17 [1] : vector<8x256xf32> to vector<8xf32>
      %32 = vector.shape_cast %31 : vector<8xf32> to vector<8x1xf32>
      %33 = arith.addf %30, %32 : vector<8x1xf32>
      %c0_18 = arith.constant 0 : index
      %c0_19 = arith.constant 0 : index
      %34 = vector.load %arg5[%c0_18, %c0_19] : memref<8x1xf32, #tpu.memory_space<vmem>>, vector<8x1xf32>
      tpu.vector_store %arg5[%c0_18, %c0_19], %33 {strides = array<i32>} : memref<8x1xf32, #tpu.memory_space<vmem>>, vector<8x1xf32>,
    } else {
    }
    %16 = arith.extui %8 : i1 to i32
    %c0_i32_9 = arith.constant 0 : i32
    %17 = arith.cmpi ne, %16, %c0_i32_9 : i32
    scf.if %17 {
      %28 = arith.mulf %6, %6 : vector<8x256xf32>
      %c0_15 = arith.constant 0 : index
      %c0_16 = arith.constant 0 : index
      %29 = vector.load %arg5[%c0_15, %c0_16] : memref<8x1xf32, #tpu.memory_space<vmem>>, vector<8x1xf32>
      %cst_17 = arith.constant dense<0.000000e+00> : vector<8xf32>
      %30 = vector.multi_reduction <add>, %28, %cst_17 [1] : vector<8x256xf32> to vector<8xf32>
      %31 = vector.shape_cast %30 : vector<8xf32> to vector<8x1xf32>
      %32 = arith.addf %29, %31 : vector<8x1xf32>
      %c0_18 = arith.constant 0 : index
      %c0_19 = arith.constant 0 : index
      %33 = vector.load %arg5[%c0_18, %c0_19] : memref<8x1xf32, #tpu.memory_space<vmem>>, vector<8x1xf32>
      tpu.vector_store %arg5[%c0_18, %c0_19], %32 {strides = array<i32>} : memref<8x1xf32, #tpu.memory_space<vmem>>, vector<8x1xf32>,
    } else {
    }
    %18 = arith.extui %7 : i1 to i32
    %c0_i32_10 = arith.constant 0 : i32
    %19 = arith.cmpi ne, %18, %c0_i32_10 : i32
    scf.if %19 {
      %c0_15 = arith.constant 0 : index
      %c0_16 = arith.constant 0 : index
      %28 = vector.load %arg5[%c0_15, %c0_16] : memref<8x1xf32, #tpu.memory_space<vmem>>, vector<8x1xf32>
      %cst_17 = arith.constant dense<0.000000e+00> : vector<8xf32>
      %29 = vector.multi_reduction <add>, %6, %cst_17 [1] : vector<8x256xf32> to vector<8xf32>
      %30 = vector.shape_cast %29 : vector<8xf32> to vector<8x1xf32>
      %31 = arith.addf %28, %30 : vector<8x1xf32>
      %c0_18 = arith.constant 0 : index
      %c0_19 = arith.constant 0 : index
      %32 = vector.load %arg5[%c0_18, %c0_19] : memref<8x1xf32, #tpu.memory_space<vmem>>, vector<8x1xf32>
      tpu.vector_store %arg5[%c0_18, %c0_19], %31 {strides = array<i32>} : memref<8x1xf32, #tpu.memory_space<vmem>>, vector<8x1xf32>,
    } else {
    }
    %20 = arith.extui %10 : i1 to i32
    %c0_i32_11 = arith.constant 0 : i32
    %21 = arith.cmpi ne, %20, %c0_i32_11 : i32
    scf.if %21 {
      %28 = arith.mulf %6, %6 : vector<8x256xf32>
      %29 = arith.mulf %28, %28 : vector<8x256xf32>
      %c0_15 = arith.constant 0 : index
      %c0_16 = arith.constant 0 : index
      %30 = vector.load %arg5[%c0_15, %c0_16] : memref<8x1xf32, #tpu.memory_space<vmem>>, vector<8x1xf32>
      %cst_17 = arith.constant dense<0.000000e+00> : vector<8xf32>
      %31 = vector.multi_reduction <add>, %29, %cst_17 [1] : vector<8x256xf32> to vector<8xf32>
      %32 = vector.shape_cast %31 : vector<8xf32> to vector<8x1xf32>
      %33 = arith.addf %30, %32 : vector<8x1xf32>
      %c0_18 = arith.constant 0 : index
      %c0_19 = arith.constant 0 : index
      %34 = vector.load %arg5[%c0_18, %c0_19] : memref<8x1xf32, #tpu.memory_space<vmem>>, vector<8x1xf32>
      tpu.vector_store %arg5[%c0_18, %c0_19], %33 {strides = array<i32>} : memref<8x1xf32, #tpu.memory_space<vmem>>, vector<8x1xf32>,
    } else {
    }
    %true = arith.constant true
    %22 = arith.xori %13, %true : i1
    %23 = arith.extui %22 : i1 to i32
    %c0_i32_12 = arith.constant 0 : i32
    %24 = arith.cmpi ne, %23, %c0_i32_12 : i32
    scf.if %24 {
      %28 = math.log %6 : vector<8x256xf32>
      %29 = vector.broadcast %0 : f32 to vector<8x256xf32>
      %30 = arith.mulf %29, %28 : vector<8x256xf32>
      %31 = math.exp %30 : vector<8x256xf32>
      %c0_15 = arith.constant 0 : index
      %c0_16 = arith.constant 0 : index
      %32 = vector.load %arg5[%c0_15, %c0_16] : memref<8x1xf32, #tpu.memory_space<vmem>>, vector<8x1xf32>
      %cst_17 = arith.constant dense<0.000000e+00> : vector<8xf32>
      %33 = vector.multi_reduction <add>, %31, %cst_17 [1] : vector<8x256xf32> to vector<8xf32>
      %34 = vector.shape_cast %33 : vector<8xf32> to vector<8x1xf32>
      %35 = arith.addf %32, %34 : vector<8x1xf32>
      %c0_18 = arith.constant 0 : index
      %c0_19 = arith.constant 0 : index
      %36 = vector.load %arg5[%c0_18, %c0_19] : memref<8x1xf32, #tpu.memory_space<vmem>>, vector<8x1xf32>
      tpu.vector_store %arg5[%c0_18, %c0_19], %35 {strides = array<i32>} : memref<8x1xf32, #tpu.memory_space<vmem>>, vector<8x1xf32>,
    } else {
    }
    %c0_i32_13 = arith.constant 0 : i32
    %25 = arith.cmpi eq, %arg1, %c0_i32_13 : i32
    %26 = arith.extui %25 : i1 to i32
    %c0_i32_14 = arith.constant 0 : i32
    %27 = arith.cmpi ne, %26, %c0_i32_14 : i32
    scf.if %27 {
      %c0_15 = arith.constant 0 : index
      %c0_16 = arith.constant 0 : index
      %28 = vector.load %arg5[%c0_15, %c0_16] : memref<8x1xf32, #tpu.memory_space<vmem>>, vector<8x1xf32>
      %cst_17 = arith.constant 3.906250e-03 : f32
      %29 = vector.broadcast %cst_17 : f32 to vector<8x1xf32>
      %30 = arith.mulf %28, %29 : vector<8x1xf32>
      %31 = math.log %30 : vector<8x1xf32>
      %cst_18 = arith.constant 1.000000e+00 : f32
      %32 = arith.divf %cst_18, %0 : f32
      %33 = vector.broadcast %32 : f32 to vector<8x1xf32>
      %34 = arith.mulf %31, %33 : vector<8x1xf32>
      %35 = math.exp %34 : vector<8x1xf32>
      %36 = vector.shape_cast %35 : vector<8x1xf32> to vector<1x8xf32>
      %c0_19 = arith.constant 0 : index
      %c0_20 = arith.constant 0 : index
      %37 = vector.load %arg4[%c0_19, %c0_20] : memref<1x8xf32, #tpu.memory_space<vmem>>, vector<1x8xf32>
      tpu.vector_store %arg4[%c0_19, %c0_20], %36 {strides = array<i32>} : memref<1x8xf32, #tpu.memory_space<vmem>>, vector<1x8xf32>,
    } else {
    }
    return
  }
  func.func @transform_0(%arg0: i32, %arg1: i32) -> (i32, i32) {
    %c0_i32 = arith.constant 0 : i32
    %c0_i32_0 = arith.constant 0 : i32
    %c0_i32_1 = arith.constant 0 : i32
    return %c0_i32, %c0_i32_0 : i32, i32
  }
  func.func @transform_1(%arg0: i32, %arg1: i32) -> (i32, i32) {
    %c0_i32 = arith.constant 0 : i32
    return %arg0, %arg1 : i32, i32
  }
  func.func @transform_2(%arg0: i32, %arg1: i32) -> (i32, i32) {
    %c0_i32 = arith.constant 0 : i32
    %c0_i32_0 = arith.constant 0 : i32
    return %arg0, %c0_i32 : i32, i32
  }
}

</mosaic_0001>

<bundles_post_ra>
// kernel: tpu_custom_call.1
= control target key start
LH: loop header
LB: loop body
LE: loop exit
PB: predicated region body
PF: predicated region fallthrough
CT: control target
= control target key end

     0   :  { %8 = vsyncpa [#allocation5], 0  ;;  %s322_s0 = inlined_call_operand.<no memory space> [shape: f32[1,1], index: 0, kind: input, shape index: {}]   ;;  %s323_s1 = inlined_call_operand.hbm [shape: f32[8,256], index: 1, kind: input, shape index: {}]   ;;  %s324_s2 = inlined_call_operand.hbm [shape: f32[1,8], index: 2, kind: output, shape index: {}]  }
   0x1   :  { %9 = vsyncpa [#allocation6], 0  ;;  %s225_s9 = smov [#allocation4]   ;;  %s177_s13 = scalar_lea.hbm %s323_s1, 256 }
   0x2   :  { %s18_s10 = sshll.u32 %s225_s9, 4  ;;  %p178_p0 = scmp.ne.s32.totalorder %s323_s1, %s177_s13  ;;  %s19_s10 = int_to_ptr.vmem [resolvable:$true] %s18_s10 }
   0x3   :  { %p181_p1 = scmp.lt.u32.totalorder %s177_s13, %s323_s1 }
   0x5   :  { %p183_p2 = pnand %p181_p1, %p178_p0 }
   0x7   :  { %186 = shalt.err (!%p183_p2)
}
   0x8   :  { %s187_s18 = scalar_lea.vmem %s19_s10, 256  ;;  %p192_p4 = scmp.lt.s32.totalorder %s19_s10, %s19_s10 }
   0x9   :  { %p188_p3 = scmp.ne.s32.totalorder %s19_s10, %s187_s18  ;;  %p193_p5 = scmp.lt.s32.totalorder %s187_s18, %s187_s18 }
   0xb   :  { %p194_p6 = por %p193_p5, %p192_p4 }
   0xd   :  { %p195_p7 = pnand %p194_p6, %p188_p3 }
   0xf   :  { %198 = shalt.err (!%p195_p7)
}
  0x10   :  { %21 = dma.hbm_to_vmem [thread:$0]  %s323_s1, 256, %s19_s10, [#allocation5]  }
  0x11   :  { %221 = dma.done.wait [#allocation5], 256  }
  0x12   :  { %222 = vsyncadd [#allocation5], 4294967040  ;;  %vm30_vm0 = vcmask 7168   ;;  %p36_p8 = scmp.eq.f32.partialorder %s322_s0, 1.0  ;;  %p37_p9 = scmp.eq.f32.partialorder %s322_s0, 2.0  ;;  %v226_v0 = vmov 0.0  }
  0x13   :  { %31 = vst.msk [vmem:[#allocation2] sm:$0xff] %vm30_vm0, %v226_v0  ;;  %p38_p10 = scmp.eq.f32.partialorder %s322_s0, 3.0  ;;  %p39_p11 = scmp.eq.f32.partialorder %s322_s0, 4.0  ;;  %v32_v1 = vld [vmem:[#allocation4] sm:$0xff]  ;;  %v33_v2 = vld [vmem:[#allocation4 + $0x8] sm:$0xff] }
  0x14   :  { %p40_p12 = por %p37_p9, %p36_p8  ;;  %v34_v3 = vmax.f32 %v32_v1, 1e-06  ;;  %v35_v4 = vmax.f32 %v33_v2, 1e-06 }
  0x15   :  { %45 = sbr.rel (!%p38_p10) target bundleno = 173 (0xad), region = 21 }
  0x16   :  { %p41_p13 = por %p40_p12, %p38_p10  ;;  %v46_v5 = vmul.f32 (%p38_p10), %v34_v3, %v34_v3  ;;  %v47_v6 = vmul.f32 (%p38_p10), %v35_v4, %v35_v4 }
  0x18   :  { %p281_p0 = por %p41_p13, %p39_p11  ;;  %v48_v7 = vmul.f32 (%p38_p10), %v46_v5, %v34_v3  ;;  %v49_v8 = vmul.f32 (%p38_p10), %v47_v6, %v35_v4 }
  0x1a   :  { %v51_v9 = vadd.f32 (%p38_p10), %v49_v8, %v48_v7  ;;  %v50_v10 = vld [vmem:[#allocation2] sm:$0xff] (%p38_p10) }
  0x1c   :  { %52 = vadd.xlane.f32.xlu0 %v51_v9 }
  0xa9   :  { %v53_v11 = vpop.xlane.xlu0 %52 }
  0xaa   :  { %v54_v12 = vadd.f32 %v53_v11, %v50_v10 }
  0xac   :  { %56 = vst.msk [vmem:[#allocation2] sm:$0xff] %vm30_vm0, %v54_v12 }
  0xad PF:  { %59 = sbr.rel (!%p37_p9) target bundleno = 322 (0x142), region = 25  ;;  %v60_v13 = vmul.f32 (%p37_p9), %v34_v3, %v34_v3  ;;  %v61_v14 = vmul.f32 (%p37_p9), %v35_v4, %v35_v4 }
  0xaf   :  { %v63_v15 = vadd.f32 (%p37_p9), %v61_v14, %v60_v13 }
  0xb1   :  { %64 = vadd.xlane.f32.xlu0 (%p37_p9), %v63_v15 }
  0xb3   :  { %v62_v16 = vld [vmem:[#allocation2] sm:$0xff] (%p37_p9) }
 0x13e   :  { %v65_v17 = vpop.xlane.xlu0 %64 }
 0x13f   :  { %v66_v18 = vadd.f32 %v65_v17, %v62_v16 }
 0x141   :  { %68 = vst.msk [vmem:[#allocation2] sm:$0xff] %vm30_vm0, %v66_v18 }
 0x142 PF:  { %71 = sbr.rel (!%p36_p8) target bundleno = 469 (0x1d5), region = 29  ;;  %v73_v19 = vadd.f32 (%p36_p8), %v35_v4, %v34_v3 }
 0x144   :  { %74 = vadd.xlane.f32.xlu0 (%p36_p8), %v73_v19 }
 0x148   :  { %v72_v20 = vld [vmem:[#allocation2] sm:$0xff] (%p36_p8) }
 0x1d1   :  { %v75_v21 = vpop.xlane.xlu0 %74 }
 0x1d2   :  { %v76_v22 = vadd.f32 %v75_v21, %v72_v20 }
 0x1d4   :  { %78 = vst.msk [vmem:[#allocation2] sm:$0xff] %vm30_vm0, %v76_v22 }
 0x1d5 PF:  { %81 = sbr.rel (!%p39_p11) target bundleno = 620 (0x26c), region = 33  ;;  %v82_v23 = vmul.f32 (%p39_p11), %v34_v3, %v34_v3  ;;  %v83_v24 = vmul.f32 (%p39_p11), %v35_v4, %v35_v4 }
 0x1d7   :  { %v84_v25 = vmul.f32 (%p39_p11), %v82_v23, %v82_v23  ;;  %v85_v26 = vmul.f32 (%p39_p11), %v83_v24, %v83_v24 }
 0x1d9   :  { %v87_v27 = vadd.f32 (%p39_p11), %v85_v26, %v84_v25 }
 0x1db   :  { %88 = vadd.xlane.f32.xlu0 (%p39_p11), %v87_v27  ;;  %v86_v28 = vld [vmem:[#allocation2] sm:$0xff] (%p39_p11) }
 0x268   :  { %v89_v29 = vpop.xlane.xlu0 %88 }
 0x269   :  { %v90_v30 = vadd.f32 %v89_v29, %v86_v28 }
 0x26b   :  { %92 = vst.msk [vmem:[#allocation2] sm:$0xff] %vm30_vm0, %v90_v30 }
 0x26c PF:  { %95 = sbr.rel (%p281_p0) target bundleno = 796 (0x31c), region = 37  ;;  %162 = vlog2.f32 (!%p281_p0), %v34_v3  ;;  %v100_v32 = vstv (!%p281_p0), %s322_s0 }
 0x26d   :  { %164 = vlog2.f32 (!%p281_p0), %v35_v4 }
 0x272   :  { %v107_v43 = vld [vmem:[#allocation2] sm:$0xff] (!%p281_p0) }
 0x276   :  { %v163_v31 = vpop.eup %162 }
 0x277   :  { %v165_v33 = vpop.eup %164  ;;  %v97_v34 = vmul.f32 0.6931472, %v163_v31 }
 0x278   :  { %v99_v35 = vmul.f32 0.6931472, %v165_v33 }
 0x279   :  { %v101_v36 = vmul.f32 %v100_v32, %v97_v34 }
 0x27a   :  { %v102_v37 = vmul.f32 %v100_v32, %v99_v35 }
 0x27b   :  { %v103_v38 = vmul.f32 1.442695, %v101_v36 }
 0x27c   :  { %v105_v39 = vmul.f32 1.442695, %v102_v37 }
 0x27d   :  { %166 = vpow2.f32 %v103_v38 }
 0x27e   :  { %168 = vpow2.f32 %v105_v39 }
 0x287   :  { %v167_v40 = vpop.eup %166 }
 0x288   :  { %v169_v41 = vpop.eup %168 }
 0x289   :  { %v108_v42 = vadd.f32 %v169_v41, %v167_v40 }
 0x28b   :  { %109 = vadd.xlane.f32.xlu0 %v108_v42 }
 0x318   :  { %v110_v44 = vpop.xlane.xlu0 %109 }
 0x319   :  { %v111_v45 = vadd.f32 %v110_v44, %v107_v43 }
 0x31b   :  { %113 = vst.msk [vmem:[#allocation2] sm:$0xff] %vm30_vm0, %v111_v45 }
 0x31c PF:  { %v121_v46 = vstv %s322_s0  ;;  %v227_v47 = vmov 0   ;;  %v132_v57 = vlaneseq  ;;  %s228_s0 = smov [#allocation7]   ;;  %vm139_vm1 = vcmask 57344  }
 0x31d   :  { %171 = vrcp.f32 %v121_v46  ;;  %170 = vset.pattern.permute.xlu0 %v227_v47  ;;  %s147_s18 = sshll.u32 %s228_s0, 4  ;;  %s148_s18 = int_to_ptr.vmem [resolvable:$true] %s147_s18 }
 0x31e   :  { %v133_v58 = vand.u32 127, %v132_v57  ;;  %v135_v59 = vshrl.u32 %v132_v57, 7  ;;  %s199_s19 = scalar_lea.vmem %s148_s18, 16  ;;  %s203_s20 = scalar_lea.vmem %s148_s18, 32 }
 0x31f   :  { %p200_p1 = scmp.ne.s32.totalorder %s148_s18, %s199_s19  ;;  %p204_p2 = scmp.lt.s32.totalorder %s148_s18, %s148_s18 }
 0x320   :  { %v136_v60 = vsub.s32 %v133_v58, %v135_v59  ;;  %p205_p3 = scmp.lt.s32.totalorder %s203_s20, %s199_s19 }
 0x322   :  { %v117_v49 = vld [vmem:[#allocation2] sm:$0xff]  ;;  %p206_p4 = por %p205_p3, %p204_p2 }
 0x323   :  { %v118_v50 = vmul.f32 0.00390625, %v117_v49 }
 0x324   :  { %p207_p5 = pnand %p206_p4, %p200_p1 }
 0x325   :  { %173 = vlog2.f32 %v118_v50 }
 0x327   :  { %v172_v48 = vpop.eup %171 }
 0x328   :  { %156 = vpush %v172_v48 }
 0x32f   :  { %v174_v51 = vpop.eup %173 }
 0x330   :  { %v120_v52 = vmul.f32 0.6931472, %v174_v51 }
 0x359   :  { %s157_s17 = spop %156 }
 0x35a   :  { %v124_v53 = vstv %s157_s17 }
 0x35b   :  { %v125_v54 = vmul.f32 %v124_v53, %v120_v52 }
 0x35d   :  { %v126_v55 = vmul.f32 1.442695, %v125_v54 }
 0x35f   :  { %175 = vpow2.f32 %v126_v55 }
 0x369   :  { %v176_v56 = vpop.eup %175 }
 0x36a   :  { %130 = vperm.xlu0 %170, %v176_v56  }
 0x3e9   :  { %v131_v61 = vpop.permute.xlu0 %130 }
 0x3ea   :  { %v137_v62 = vrot.slane %v131_v61, %v136_v60 }
 0x3ec   :  { %140 = vst.msk [vmem:[#allocation7] sm:$0x1] %vm139_vm1, %v137_v62 }
 0x3ed   :  { %210 = shalt.err (!%p207_p5)
}
 0x3ee   :  { %s211_s23 = scalar_lea.hbm %s324_s2, 16 }
 0x3ef   :  { %p212_p6 = scmp.ne.s32.totalorder %s324_s2, %s211_s23  ;;  %p215_p7 = scmp.lt.u32.totalorder %s211_s23, %s324_s2 }
 0x3f1   :  { %p217_p8 = pnand %p215_p7, %p212_p6 }
 0x3f3   :  { %220 = shalt.err (!%p217_p8)
}
 0x3f4   :  { %150 = dma.vmem_to_hbm [thread:$0]  %s148_s18, 16, %s324_s2, [#allocation6]  }
 0x3f5   :  { %223 = dma.done.wait [#allocation6], 16  }
 0x3f6   :  { %224 = vsyncadd [#allocation6], 4294967280 }
 0x3f7   :  { %154 = vsyncpa [#allocation5], 1 }
 0x3f8   :  { %155 = vsyncpa [#allocation6], 1 }

</bundles_post_ra>
